<compile_context>
chip_gen: v7x
topology: tpu7x:2x2x1
jax: 0.10.0
libtpu: 0.0.40
codegen_flags: <defaults>
</compile_context>

<pallas_src>
import math

import jax
import jax.numpy as jnp
from jax.experimental import pallas as pl
from jax.experimental.pallas import tpu as pltpu

KH = KW = 3  # 3x3 conv, padding=1, stride=1


def _conv_relu_kernel(x_ref, w_ref, b_ref, o_ref):
    """FB frames per grid step.

    x_ref: (FB, H+2, W*C)      vertically zero-padded frames, rows flat (w,c)
    w_ref: (KH*W*C, W*Cout)    banded conv weight (horizontal taps + pad folded)
    b_ref: (1, W*Cout)         bias tiled over W (f32)
    o_ref: (FB*H, W*Cout)      lane-dense output slab (f32)
    """
    FB = x_ref.shape[0]
    H = x_ref.shape[1] - 2
    K = w_ref.shape[0]                    # KH * W * C

    # im2col over the vertical taps only (horizontal taps live in the band):
    # one lane-axis concat, one MXU dot, bias add, fused ReLU.
    lhs = jnp.concatenate([x_ref[:, kh:kh + H, :] for kh in range(KH)], axis=-1)
    lhs = lhs.reshape(FB * H, K)
    acc = jnp.dot(lhs, w_ref[...], preferred_element_type=jnp.float32)
    acc = acc + b_ref[...]
    o_ref[...] = jnp.maximum(acc, 0.0).astype(o_ref.dtype)


def _build_banded_weight(w, W):
    """Fold the KW horizontal taps AND the 1-px horizontal zero pad of an HWIO
    conv weight into a band matrix over unpadded input columns.

    w: (KH, KW, C, Cout) -> (KH*W*C, W*Cout) with
    band[kh*W*C + wi*C + c, wo*Cout + co] = w[kh, wi - wo + 1, c, co]
    when 0 <= wi - wo + 1 < KW, else 0 (the zero pad columns simply vanish).
    """
    KHh, KWw, C, Cout = w.shape
    wi = jnp.arange(W)
    wo = jnp.arange(W)
    kw = wi[:, None] - wo[None, :] + (KWw // 2)          # (W, W)
    valid = (kw >= 0) & (kw < KWw)
    kw_c = jnp.clip(kw, 0, KWw - 1)
    band = w[:, kw_c, :, :]                              # (KH, W, W, C, Cout)
    band = jnp.where(valid[None, :, :, None, None], band, 0.0)
    band = jnp.transpose(band, (0, 1, 3, 2, 4))          # (KH, wi, C, wo, Cout)
    return band.reshape(KHh * W * C, W * Cout)


def _physical_vmem_bytes():
    try:
        info = pltpu.get_tpu_info()
        v = int(getattr(info, "vmem_capacity_bytes", 0))
        if v > 0:
            return v
    except Exception:
        pass
    return 64 << 20  # conservative fallback = v7x per-core VMEM


def _num_tensorcores():
    try:
        d = jax.devices()[0]
        for attr in ("num_cores", "core_count"):
            v = getattr(d, attr, None)
            if isinstance(v, int) and v > 0:
                return v
    except Exception:
        pass
    return 1


def _vmem_bytes_needed(fb, H, W, C, Cout, in_isz):
    """Honest per-step VMEM footprint: resident band+bias, double-buffered
    input/output blocks, in-kernel im2col temp and f32 accumulator."""
    K = KH * W * C
    NOUT = W * Cout
    band = K * NOUT * in_isz + NOUT * 4
    in_blk = fb * (H + 2) * W * C * in_isz
    out_blk = fb * H * NOUT * 4
    lhs_tmp = fb * H * K * in_isz
    acc_tmp = fb * H * NOUT * 4
    return band + 2 * in_blk + 2 * out_blk + lhs_tmp + acc_tmp


def _round_up(a, b):
    return -(-a // b) * b


def _pick_tiling(nt, H, W, C, Cout, in_isz):
    """Choose frames-per-block FB, grid steps and (padded) NT.

    - Largest FB whose honest VMEM footprint fits a quarter of physical VMEM.
    - On multi-TensorCore chips (v7x) the step count is rounded to a multiple
      of the core count; on single-TC chips (v5e/v6e) one big block is allowed.
    - NT is padded up to FB*steps (ragged NT never degrades to FB=1).
    - (FB*H) is kept 8-sublane aligned whenever the output is actually tiled.
    """
    budget = _physical_vmem_bytes() // 4
    cores = _num_tensorcores()

    def fits(fb):
        return _vmem_bytes_needed(fb, H, W, C, Cout, in_isz) <= budget

    fb_cap = 1
    while fb_cap < nt and fits(fb_cap + 1):
        fb_cap += 1

    steps = -(-nt // fb_cap)
    if cores > 1:
        steps = min(_round_up(steps, cores), nt)
    fb = -(-nt // steps)

    if steps > 1 and (fb * H) % 8:
        g = 8 // math.gcd(H, 8)
        fb2 = _round_up(fb, g)
        if fits(fb2):
            fb = fb2
        elif fits(nt):
            steps, fb = 1, nt
        # TODO(synk): H with awkward sublane alignment and NT too large for a
        # single VMEM block would need an Element-indexed output BlockSpec.
    nt_pad = fb * steps
    return fb, steps, nt_pad


def _frame_conv_relu(x_nhwc, w, b, *, use_bf16=False):
    """conv3x3(pad=1) + bias + ReLU over a batch of NHWC frames via Pallas."""
    NT, H, W, C = x_nhwc.shape
    Cout = w.shape[-1]
    in_dtype = jnp.bfloat16 if use_bf16 else jnp.float32
    in_isz = jnp.dtype(in_dtype).itemsize

    # Vertical 1-px zero pad only; the horizontal pad is absorbed into the
    # band, so the kernel's input lane width is W*C (not (W+2)*C).
    xp = jnp.pad(x_nhwc, ((0, 0), (1, 1), (0, 0), (0, 0)))
    xp = xp.reshape(NT, H + 2, W * C).astype(in_dtype)

    w_band = _build_banded_weight(w, W).astype(in_dtype)   # (KH*W*C, W*Cout)
    b_row = jnp.tile(b.reshape(-1), W).reshape(1, W * Cout).astype(jnp.float32)

    FB, steps, NT_pad = _pick_tiling(NT, H, W, C, Cout, in_isz)
    if NT_pad != NT:
        xp = jnp.pad(xp, ((0, NT_pad - NT), (0, 0), (0, 0)))

    K = KH * W * C
    NOUT = W * Cout

    flops = 2 * NT_pad * H * K * NOUT
    bytes_accessed = (xp.size * xp.dtype.itemsize
                      + NT_pad * H * NOUT * 4
                      + w_band.size * w_band.dtype.itemsize
                      + b_row.size * 4)

    vmem_need = _vmem_bytes_needed(FB, H, W, C, Cout, in_isz)
    phys = _physical_vmem_bytes()
    vmem_limit = int(min(phys, max(2 * vmem_need, 32 << 20)))

    out2d = pl.pallas_call(
        _conv_relu_kernel,
        out_shape=jax.ShapeDtypeStruct((NT_pad * H, NOUT), jnp.float32),
        grid=(steps,),
        in_specs=[
            pl.BlockSpec((FB, H + 2, W * C), lambda i: (i, 0, 0)),
            pl.BlockSpec((K, NOUT), lambda i: (0, 0)),
            pl.BlockSpec((1, NOUT), lambda i: (0, 0)),
        ],
        out_specs=pl.BlockSpec((FB * H, NOUT), lambda i: (i, 0)),
        compiler_params=pltpu.CompilerParams(
            dimension_semantics=("parallel",),
            vmem_limit_bytes=vmem_limit),
        cost_estimate=pl.CostEstimate(flops=flops, transcendentals=0,
                                      bytes_accessed=bytes_accessed),
    )(xp, w_band, b_row)

    out = out2d.reshape(NT_pad, H, W, Cout)
    if NT_pad != NT:
        out = out[:NT]
    return out


def from3d_forward(x_ncthw, w, b, *, use_bf16=False):
    """Pallas implementation of From3D.forward.

    x_ncthw: (N, C, T, H, W)  -- PyTorch NCTHW convention
    returns: (N, Cout, T, H, W)
    """
    N, C, T, H, W = x_ncthw.shape

    # x.permute(0, 2, 1, 3, 4).view(-1, C, h, w)   [+ NCHW -> NHWC for TPU]
    # TODO(synk): if the downstream consumer accepts channels-last
    # (N, T, H, W, C') the final transpose back (a full HBM pass) can be
    # dropped; kept here to preserve the module's NC'THW output contract.
    xx = jnp.transpose(x_ncthw, (0, 2, 3, 4, 1)).reshape(N * T, H, W, C)

    m = _frame_conv_relu(xx, w, b, use_bf16=use_bf16)        # (N*T, H, W, Cout)

    # m.view(N, T, C', H', W').permute(0, 2, 1, 3, 4)
    Cout = m.shape[-1]
    m = m.reshape(N, T, H, W, Cout)
    return jnp.transpose(m, (0, 4, 1, 2, 3))                 # (N, Cout, T, H, W)


def _reference_forward(x_ncthw, w, b):
    """Pure-JAX reference (lax.conv) for correctness checking."""
    N, C, T, H, W = x_ncthw.shape
    xx = jnp.transpose(x_ncthw, (0, 2, 1, 3, 4)).reshape(N * T, C, H, W)
    y = jax.lax.conv_general_dilated(
        xx, w, window_strides=(1, 1), padding="SAME",
        dimension_numbers=("NCHW", "HWIO", "NCHW"))
    y = jnp.maximum(y + b.reshape(1, -1, 1, 1), 0.0)
    Cout = y.shape[1]
    return jnp.transpose(y.reshape(N, T, Cout, H, W), (0, 2, 1, 3, 4))


if __name__ == "__main__":
    N, C, T, H, W = 2, 4, 8, 16, 16
    Cout = 8

    key = jax.random.PRNGKey(0)
    kx, kw, kb = jax.random.split(key, 3)

    x = jax.random.normal(kx, (N, C, T, H, W), dtype=jnp.float32)
    # Deterministic synthetic parameters for the inner 2D model (HWIO layout).
    w = jax.random.normal(kw, (KH, KW, C, Cout), dtype=jnp.float32) * 0.1
    b = jax.random.normal(kb, (Cout,), dtype=jnp.float32) * 0.1

    ref = _reference_forward(x, w, b)

    # f32 path (default) — tight tolerance against the lax.conv reference.
    out = jax.block_until_ready(from3d_forward(x, w, b))
    assert out.shape == (N, Cout, T, H, W), out.shape
    assert jnp.allclose(out, ref, atol=1e-3, rtol=1e-3), "f32 mismatch vs reference"

    # bf16 DMA/MXU path (f32 accumulation) — looser tolerance.
    out_bf16 = jax.block_until_ready(from3d_forward(x, w, b, use_bf16=True))
    assert out_bf16.shape == (N, Cout, T, H, W), out_bf16.shape
    assert jnp.allclose(out_bf16, ref, atol=1e-1, rtol=1e-2), "bf16 mismatch vs reference"

    print("KERNEL_OK")
</pallas_src>

<mosaic_0001>
module attributes {stable_mosaic.version = 11 : i64} {
  func.func @_conv_relu_kernel(%arg0: i32, %arg1: memref<16x18x64xf32, #tpu.memory_space<vmem>>, %arg2: memref<192x128xf32, #tpu.memory_space<vmem>>, %arg3: memref<1x128xf32, #tpu.memory_space<vmem>>, %arg4: memref<256x128xf32, #tpu.memory_space<vmem>>) attributes {dimension_semantics = [#tpu.dimension_semantics<parallel>], iteration_bounds = array<i64: 1>, scalar_prefetch = 0 : i64, scratch_operands = 0 : i64, tpu.core_type = #tpu.core_type<tc>, window_params = [{transform_indices = @transform_0, window_bounds = array<i64: 16, 18, 64>}, {pipeline_mode = #tpu.pipeline_mode<synchronous>, transform_indices = @transform_1, window_bounds = array<i64: 192, 128>}, {pipeline_mode = #tpu.pipeline_mode<synchronous>, transform_indices = @transform_2, window_bounds = array<i64: 1, 128>}, {transform_indices = @transform_3, window_bounds = array<i64: 256, 128>}]} {
    %c0 = arith.constant 0 : index
    %c0_0 = arith.constant 0 : index
    %c0_1 = arith.constant 0 : index
    %0 = vector.load %arg1[%c0, %c0_0, %c0_1] : memref<16x18x64xf32, #tpu.memory_space<vmem>>, vector<16x16x64xf32>
    %c0_2 = arith.constant 0 : index
    %c1 = arith.constant 1 : index
    %c0_3 = arith.constant 0 : index
    %1 = vector.load %arg1[%c0_2, %c1, %c0_3] : memref<16x18x64xf32, #tpu.memory_space<vmem>>, vector<16x16x64xf32>
    %c0_4 = arith.constant 0 : index
    %c2 = arith.constant 2 : index
    %c0_5 = arith.constant 0 : index
    %2 = vector.load %arg1[%c0_4, %c2, %c0_5] : memref<16x18x64xf32, #tpu.memory_space<vmem>>, vector<16x16x64xf32>
    %3 = tpu.concatenate %0, %1, %2 in 2 : vector<16x16x64xf32>, vector<16x16x64xf32>, vector<16x16x64xf32> -> vector<16x16x192xf32>
    %4 = vector.shape_cast %3 : vector<16x16x192xf32> to vector<256x192xf32>
    %c0_6 = arith.constant 0 : index
    %c0_7 = arith.constant 0 : index
    %5 = vector.load %arg2[%c0_6, %c0_7] : memref<192x128xf32, #tpu.memory_space<vmem>>, vector<192x128xf32>
    %cst = arith.constant dense<0.000000e+00> : vector<256x128xf32>
    %6 = tpu.matmul %4, %5, %cst {dimension_numbers = #tpu.dot_dimension_numbers<[1], [0], [0], [1], [0, 0, 1, 1], [], []>} : vector<256x192xf32>, vector<192x128xf32>, vector<256x128xf32> -> vector<256x128xf32>
    %c0_8 = arith.constant 0 : index
    %c0_9 = arith.constant 0 : index
    %7 = vector.load %arg3[%c0_8, %c0_9] : memref<1x128xf32, #tpu.memory_space<vmem>>, vector<1x128xf32>
    %8 = vector.broadcast %7 : vector<1x128xf32> to vector<256x128xf32>
    %9 = arith.addf %6, %8 : vector<256x128xf32>
    %cst_10 = arith.constant 0.000000e+00 : f32
    %10 = vector.broadcast %cst_10 : f32 to vector<256x128xf32>
    %11 = arith.maximumf %9, %10 : vector<256x128xf32>
    %c0_11 = arith.constant 0 : index
    %c0_12 = arith.constant 0 : index
    %12 = vector.load %arg4[%c0_11, %c0_12] : memref<256x128xf32, #tpu.memory_space<vmem>>, vector<256x128xf32>
    tpu.vector_store %arg4[%c0_11, %c0_12], %11 {strides = array<i32>} : memref<256x128xf32, #tpu.memory_space<vmem>>, vector<256x128xf32>,
    return
  }
  func.func @transform_0(%arg0: i32) -> (i32, i32, i32) {
    %c0_i32 = arith.constant 0 : i32
    %c0_i32_0 = arith.constant 0 : i32
    %c0_i32_1 = arith.constant 0 : i32
    return %arg0, %c0_i32, %c0_i32_0 : i32, i32, i32
  }
  func.func @transform_1(%arg0: i32) -> (i32, i32) {
    %c0_i32 = arith.constant 0 : i32
    %c0_i32_0 = arith.constant 0 : i32
    %c0_i32_1 = arith.constant 0 : i32
    return %c0_i32, %c0_i32_0 : i32, i32
  }
  func.func @transform_2(%arg0: i32) -> (i32, i32) {
    %c0_i32 = arith.constant 0 : i32
    %c0_i32_0 = arith.constant 0 : i32
    %c0_i32_1 = arith.constant 0 : i32
    return %c0_i32, %c0_i32_0 : i32, i32
  }
  func.func @transform_3(%arg0: i32) -> (i32, i32) {
    %c0_i32 = arith.constant 0 : i32
    %c0_i32_0 = arith.constant 0 : i32
    return %arg0, %c0_i32 : i32, i32
  }
}

</mosaic_0001>

<bundles_post_ra>
// kernel: tpu_custom_call.1
= control target key start
LH: loop header
LB: loop body
LE: loop exit
PB: predicated region body
PF: predicated region fallthrough
CT: control target
= control target key end

     0   :  { %v906_v7 = vmov 0.0|0.0   ;;  %s907_s28 = smov 64   ;;  %vm239_vm0 = vcmask 523264   ;;  %s1444_s0 = inlined_call_operand.vmem [shape: f32[16,18,64], index: 0, kind: input, shape index: {}]   ;;  %s1445_s1 = inlined_call_operand.vmem [shape: f32[192,128], index: 1, kind: input, shape index: {}]   ;;  %s1446_s2 = inlined_call_operand.vmem [shape: f32[1,128], index: 2, kind: input, shape index: {}]   ;;  %s1447_s3 = inlined_call_operand.hbm [shape: f32[256,128], index: 3, kind: output, shape index: {}]  }
   0x1   :  { %v47_v0 = vld [vmem:[%s1444_s0 + $0x1] sm:$0xff]  ;;  %v48_v2 = vld [vmem:[%s1444_s0 + $0x9] sm:$0xff]  ;;  %v49_v5 = vld [vmem:[%s1444_s0 + $0x19] sm:$0xff]  ;;  %737 = vmatprep.subr.bf16.mxu0 %v906_v7  ;;  %773 = vmatprep.subr.bf16.mxu1 %v906_v7 }
   0x2   :  { %v63_v1 = vld [vmem:[%s1444_s0 + $0xc1] sm:$0xff]  ;;  %v64_v4 = vld [vmem:[%s1444_s0 + $0xc9] sm:$0xff]  ;;  %v65_v6 = vld [vmem:[%s1444_s0 + $0xd9] sm:$0xff] }
   0x3   :  { %v802_v3 = vpack.i.bf16 %v63_v1, %v47_v0  ;;  %v812_v8 = vpack.i.bf16 %v65_v6, %v49_v5  ;;  %v50_v9 = vld [vmem:[%s1444_s0 + $0x21] sm:$0xff]  ;;  %v807_v11 = vpack.i.bf16 %v64_v4, %v48_v2  ;;  %v51_v13 = vld [vmem:[%s1444_s0 + $0x31] sm:$0xff]  ;;  %v52_v15 = vld [vmem:[%s1444_s0 + $0x39] sm:$0xff] }
   0x4   :  { %v66_v10 = vld [vmem:[%s1444_s0 + $0xe1] sm:$0xff]  ;;  %v67_v14 = vld [vmem:[%s1444_s0 + $0xf1] sm:$0xff]  ;;  %v68_v16 = vld [vmem:[%s1444_s0 + $0xf9] sm:$0xff] }
   0x5   :  { %803 = vrot.lane.b32.xlu0 %v802_v3, %s907_s28  ;;  %813 = vrot.lane.b32.xlu1 %v812_v8, %s907_s28  ;;  %v817_v12 = vpack.i.bf16 %v66_v10, %v50_v9  ;;  %v822_v17 = vpack.i.bf16 %v67_v14, %v51_v13  ;;  %v827_v18 = vpack.i.bf16 %v68_v16, %v52_v15  ;;  %v53_v19 = vld [vmem:[%s1444_s0 + $0x49] sm:$0xff]  ;;  %v54_v21 = vld [vmem:[%s1444_s0 + $0x51] sm:$0xff] }
   0x6   :  { %v69_v20 = vld [vmem:[%s1444_s0 + $0x109] sm:$0xff]  ;;  %v70_v22 = vld [vmem:[%s1444_s0 + $0x111] sm:$0xff]  ;;  %v272_v23 = vld [vmem:[%s1445_s1] sm:$0xff] }
   0x7   :  { %v832_v24 = vpack.i.bf16 %v69_v20, %v53_v19  ;;  %v273_v25 = vld [vmem:[%s1445_s1 + $0x8] sm:$0xff]  ;;  %v274_v26 = vld [vmem:[%s1445_s1 + $0x10] sm:$0xff]  ;;  %v275_v27 = vld [vmem:[%s1445_s1 + $0x18] sm:$0xff]  ;;  %v837_v28 = vpack.i.bf16 %v70_v22, %v54_v21 }
   0x8   :  { %v55_v29 = vld [vmem:[%s1444_s0 + $0x61] sm:$0xff]  ;;  %v738_v31 = vpack.c.bf16 %v273_v25, %v272_v23  ;;  %v56_v32 = vld [vmem:[%s1444_s0 + $0x69] sm:$0xff]  ;;  %v741_v34 = vpack.c.bf16 %v275_v27, %v274_v26  ;;  %v57_v39 = vld [vmem:[%s1444_s0 + $0x79] sm:$0xff] }
   0x9   :  { %808 = vrot.lane.b32.xlu0 %v807_v11, %s907_s28  ;;  %818 = vrot.lane.b32.xlu1 %v817_v12, %s907_s28  ;;  %v71_v30 = vld [vmem:[%s1444_s0 + $0x121] sm:$0xff]  ;;  %v72_v33 = vld [vmem:[%s1444_s0 + $0x129] sm:$0xff] }
   0xa   :  { %739 = vmatpush1.bf16.msra.mxu0 %v738_v31  ;;  %785 = vmatpush1.bf16.msra.mxu1 %v738_v31  ;;  %v842_v35 = vpack.i.bf16 %v71_v30, %v55_v29  ;;  %v276_v36 = vld [vmem:[%s1445_s1 + $0x20] sm:$0xff]  ;;  %v277_v37 = vld [vmem:[%s1445_s1 + $0x28] sm:$0xff]  ;;  %v847_v38 = vpack.i.bf16 %v72_v33, %v56_v32  ;;  %v278_v46 = vld [vmem:[%s1445_s1 + $0x30] sm:$0xff] }
   0xb   :  { %740 = vmatprep.subr.bf16.mxu0 %v906_v7  ;;  %v73_v40 = vld [vmem:[%s1444_s0 + $0x139] sm:$0xff]  ;;  %774 = vmatprep.subr.bf16.mxu1 %v906_v7  ;;  %v58_v41 = vld [vmem:[%s1444_s0 + $0x81] sm:$0xff]  ;;  %v744_v43 = vpack.c.bf16 %v277_v37, %v276_v36  ;;  %v59_v50 = vld [vmem:[%s1444_s0 + $0x91] sm:$0xff] }
   0xc   :  { %v74_v42 = vld [vmem:[%s1444_s0 + $0x141] sm:$0xff]  ;;  %v852_v45 = vpack.i.bf16 %v73_v40, %v57_v39  ;;  %v279_v47 = vld [vmem:[%s1445_s1 + $0x38] sm:$0xff]  ;;  %v61_v59 = vld [vmem:[%s1444_s0 + $0xa9] sm:$0xff] }
   0xd   :  { %823 = vrot.lane.b32.xlu0 %v822_v17, %s907_s28  ;;  %828 = vrot.lane.b32.xlu1 %v827_v18, %s907_s28  ;;  %v79_v44 = vld [vmem:[%s1444_s0 + $0x2] sm:$0xff]  ;;  %v857_v49 = vpack.i.bf16 %v74_v42, %v58_v41  ;;  %v75_v51 = vld [vmem:[%s1444_s0 + $0x151] sm:$0xff]  ;;  %v747_v54 = vpack.c.bf16 %v279_v47, %v278_v46 }
   0xe   :  { %742 = vmatpush1.bf16.msra.mxu0 %v741_v34  ;;  %786 = vmatpush1.bf16.msra.mxu1 %v741_v34  ;;  %v95_v48 = vld [vmem:[%s1444_s0 + $0xc2] sm:$0xff]  ;;  %v60_v52 = vld [vmem:[%s1444_s0 + $0x99] sm:$0xff]  ;;  %v862_v55 = vpack.i.bf16 %v75_v51, %v59_v50  ;;  %v62_v61 = vld [vmem:[%s1444_s0 + $0xb1] sm:$0xff] }
   0xf   :  { %743 = vmatprep.subr.bf16.mxu0 %v906_v7  ;;  %775 = vmatprep.subr.bf16.mxu1 %v906_v7  ;;  %v76_v53 = vld [vmem:[%s1444_s0 + $0x159] sm:$0xff]  ;;  %v281_v57 = vld [vmem:[%s1445_s1 + $0x48] sm:$0xff]  ;;  %v78_v62 = vld [vmem:[%s1444_s0 + $0x171] sm:$0xff] }
  0x10   :  { %705 = vmatprep.mubr.msk.f32.mxu0 %vm239_vm0, %v79_v44  ;;  %721 = vmatprep.mubr.msk.f32.mxu1 %vm239_vm0, %v95_v48  ;;  %v280_v56 = vld [vmem:[%s1445_s1 + $0x40] sm:$0xff]  ;;  %v867_v58 = vpack.i.bf16 %v76_v53, %v60_v52  ;;  %v77_v60 = vld [vmem:[%s1444_s0 + $0x169] sm:$0xff]  ;;  %v283_v2 = vld [vmem:[%s1445_s1 + $0x58] sm:$0xff]  ;;  %v877_v3 = vpack.i.bf16 %v78_v62, %v62_v61 }
  0x11   :  { %833 = vrot.lane.b32.xlu0 %v832_v24, %s907_s28  ;;  %838 = vrot.lane.b32.xlu1 %v837_v28, %s907_s28  ;;  %v750_v63 = vpack.c.bf16 %v281_v57, %v280_v56  ;;  %v872_v0 = vpack.i.bf16 %v77_v60, %v61_v59  ;;  %v282_v1 = vld [vmem:[%s1445_s1 + $0x50] sm:$0xff]  ;;  %v284_v5 = vld [vmem:[%s1445_s1 + $0x60] sm:$0xff] }
  0x12   :  { %745 = vmatpush1.bf16.msra.mxu0 %v744_v43  ;;  %787 = vmatpush1.bf16.msra.mxu1 %v744_v43  ;;  %v753_v4 = vpack.c.bf16 %v283_v2, %v282_v1  ;;  %v285_v6 = vld [vmem:[%s1445_s1 + $0x68] sm:$0xff] }
  0x13   :  { %746 = vmatprep.subr.bf16.mxu0 %v906_v7  ;;  %776 = vmatprep.subr.bf16.mxu1 %v906_v7 }
  0x15   :  { %843 = vrot.lane.b32.xlu0 %v842_v35, %s907_s28  ;;  %848 = vrot.lane.b32.xlu1 %v847_v38, %s907_s28 }
  0x16   :  { %748 = vmatpush1.bf16.msra.mxu0 %v747_v54  ;;  %788 = vmatpush1.bf16.msra.mxu1 %v747_v54 }
  0x17   :  { %749 = vmatprep.subr.bf16.mxu0 %v906_v7  ;;  %777 = vmatprep.subr.bf16.mxu1 %v906_v7 }
  0x19   :  { %853 = vrot.lane.b32.xlu0 %v852_v45, %s907_s28  ;;  %858 = vrot.lane.b32.xlu1 %v857_v49, %s907_s28 }
  0x1a   :  { %751 = vmatpush1.bf16.msra.mxu0 %v750_v63  ;;  %789 = vmatpush1.bf16.msra.mxu1 %v750_v63 }
  0x1b   :  { %752 = vmatprep.subr.bf16.mxu0 %v906_v7  ;;  %778 = vmatprep.subr.bf16.mxu1 %v906_v7 }
  0x1d   :  { %863 = vrot.lane.b32.xlu0 %v862_v55, %s907_s28  ;;  %868 = vrot.lane.b32.xlu1 %v867_v58, %s907_s28 }
  0x21   :  { %873 = vrot.lane.b32.xlu0 %v872_v0, %s907_s28  ;;  %878 = vrot.lane.b32.xlu1 %v877_v3, %s907_s28 }
  0x22   :  { %8 = vsyncpa [#allocation3], 0  ;;  %754 = vmatpush1.bf16.msra.mxu0 %v753_v4  ;;  %790 = vmatpush1.bf16.msra.mxu1 %v753_v4  ;;  %v756_v8 = vpack.c.bf16 %v285_v6, %v284_v5  ;;  %v286_v9 = vld [vmem:[%s1445_s1 + $0x70] sm:$0xff]  ;;  %v287_v10 = vld [vmem:[%s1445_s1 + $0x78] sm:$0xff] }
  0x23   :  { %755 = vmatprep.subr.bf16.mxu0 %v906_v7  ;;  %779 = vmatprep.subr.bf16.mxu1 %v906_v7  ;;  %v759_v11 = vpack.c.bf16 %v287_v10, %v286_v9  ;;  %v288_v12 = vld [vmem:[%s1445_s1 + $0x80] sm:$0xff]  ;;  %v289_v13 = vld [vmem:[%s1445_s1 + $0x88] sm:$0xff]  ;;  %v290_v15 = vld [vmem:[%s1445_s1 + $0x90] sm:$0xff] }
  0x24   :  { %v762_v14 = vpack.c.bf16 %v289_v13, %v288_v12  ;;  %v291_v16 = vld [vmem:[%s1445_s1 + $0x98] sm:$0xff]  ;;  %v292_v18 = vld [vmem:[%s1445_s1 + $0xa0] sm:$0xff]  ;;  %v293_v19 = vld [vmem:[%s1445_s1 + $0xa8] sm:$0xff] }
  0x25   :  { %v765_v17 = vpack.c.bf16 %v291_v16, %v290_v15  ;;  %v768_v20 = vpack.c.bf16 %v293_v19, %v292_v18  ;;  %v294_v21 = vld [vmem:[%s1445_s1 + $0xb0] sm:$0xff]  ;;  %v295_v22 = vld [vmem:[%s1445_s1 + $0xb8] sm:$0xff]  ;;  %v15_v25 = vld [vmem:[%s1444_s0] sm:$0xff] }
  0x26   :  { %757 = vmatpush1.bf16.msra.mxu0 %v756_v8  ;;  %791 = vmatpush1.bf16.msra.mxu1 %v756_v8  ;;  %v771_v23 = vpack.c.bf16 %v295_v22, %v294_v21  ;;  %v31_v26 = vld [vmem:[%s1444_s0 + $0xc0] sm:$0xff]  ;;  %v80_v30 = vld [vmem:[%s1444_s0 + $0xa] sm:$0xff]  ;;  %v17_v43 = vld [vmem:[%s1444_s0 + $0x18] sm:$0xff] }
  0x27   :  { %758 = vmatprep.subr.bf16.mxu0 %v906_v7  ;;  %780 = vmatprep.subr.bf16.mxu1 %v906_v7  ;;  %v16_v34 = vld [vmem:[%s1444_s0 + $0x8] sm:$0xff]  ;;  %v81_v40 = vld [vmem:[%s1444_s0 + $0x1a] sm:$0xff]  ;;  %v83_v60 = vld [vmem:[%s1444_s0 + $0x32] sm:$0xff] }
  0x28   :  { %v32_v35 = vld [vmem:[%s1444_s0 + $0xc8] sm:$0xff]  ;;  %v97_v41 = vld [vmem:[%s1444_s0 + $0xda] sm:$0xff]  ;;  %v99_v61 = vld [vmem:[%s1444_s0 + $0xf2] sm:$0xff] }
  0x29   :  { %v33_v44 = vld [vmem:[%s1444_s0 + $0xd8] sm:$0xff]  ;;  %v82_v51 = vld [vmem:[%s1444_s0 + $0x22] sm:$0xff]  ;;  %v19_v63 = vld [vmem:[%s1444_s0 + $0x30] sm:$0xff] }
  0x2a   :  { %760 = vmatpush1.bf16.msra.mxu0 %v759_v11  ;;  %792 = vmatpush1.bf16.msra.mxu1 %v759_v11  ;;  %v98_v52 = vld [vmem:[%s1444_s0 + $0xe2] sm:$0xff]  ;;  %v35_v0 = vld [vmem:[%s1444_s0 + $0xf0] sm:$0xff]  ;;  %v84_v5 = vld [vmem:[%s1444_s0 + $0x3a] sm:$0xff] }
  0x2b   :  { %761 = vmatprep.subr.bf16.mxu0 %v906_v7  ;;  %781 = vmatprep.subr.bf16.mxu1 %v906_v7  ;;  %v18_v54 = vld [vmem:[%s1444_s0 + $0x20] sm:$0xff]  ;;  %v20_v9 = vld [vmem:[%s1444_s0 + $0x38] sm:$0xff]  ;;  %v85_v15 = vld [vmem:[%s1444_s0 + $0x4a] sm:$0xff] }
  0x2c   :  { %v34_v55 = vld [vmem:[%s1444_s0 + $0xe0] sm:$0xff]  ;;  %v36_v10 = vld [vmem:[%s1444_s0 + $0xf8] sm:$0xff]  ;;  %v101_v16 = vld [vmem:[%s1444_s0 + $0x10a] sm:$0xff] }
  0x2d   :  { %v100_v6 = vld [vmem:[%s1444_s0 + $0xfa] sm:$0xff]  ;;  %v21_v18 = vld [vmem:[%s1444_s0 + $0x48] sm:$0xff] }
  0x2e   :  { %763 = vmatpush1.bf16.msra.mxu0 %v762_v14  ;;  %793 = vmatpush1.bf16.msra.mxu1 %v762_v14  ;;  %v37_v19 = vld [vmem:[%s1444_s0 + $0x108] sm:$0xff] }
  0x2f   :  { %764 = vmatprep.subr.bf16.mxu0 %v906_v7  ;;  %782 = vmatprep.subr.bf16.mxu1 %v906_v7 }
  0x32   :  { %766 = vmatpush1.bf16.msra.mxu0 %v765_v17  ;;  %794 = vmatpush1.bf16.msra.mxu1 %v765_v17 }
  0x33   :  { %767 = vmatprep.subr.bf16.mxu0 %v906_v7  ;;  %783 = vmatprep.subr.bf16.mxu1 %v906_v7 }
  0x36   :  { %769 = vmatpush1.bf16.msra.mxu0 %v768_v20  ;;  %795 = vmatpush1.bf16.msra.mxu1 %v768_v20 }
  0x37   :  { %770 = vmatprep.subr.bf16.mxu0 %v906_v7  ;;  %784 = vmatprep.subr.bf16.mxu1 %v906_v7  ;;  %v96_v7 = vld [vmem:[%s1444_s0 + $0xca] sm:$0xff] }
  0x3a   :  { %772 = vmatpush1.bf16.msra.mxu0 %v771_v23  ;;  %796 = vmatpush1.bf16.msra.mxu1 %v771_v23 }
  0x77   :  { %v804_v24 = vpop.permute.xlu0 %803  ;;  %v814_v29 = vpop.permute.xlu1 %813 }
  0x78   :  { %v806_v27 = vunpack.i.h.bf16 %v804_v24  ;;  %v805_v28 = vunpack.i.l.bf16 %v804_v24  ;;  %v816_v38 = vunpack.i.h.bf16 %v814_v29  ;;  %v815_v39 = vunpack.i.l.bf16 %v814_v29  ;;  %v86_v24 = vld [vmem:[%s1444_s0 + $0x52] sm:$0xff] }
  0x7a   :  { %v240_v31 = vsel %vm239_vm0, %v15_v25, %v805_v28  ;;  %v256_v32 = vsel %vm239_vm0, %v31_v26, %v806_v27  ;;  %v242_v49 = vsel %vm239_vm0, %v17_v43, %v815_v39  ;;  %v258_v50 = vsel %vm239_vm0, %v33_v44, %v816_v38  ;;  %v102_v25 = vld [vmem:[%s1444_s0 + $0x112] sm:$0xff]  ;;  %v24_v44 = vld [vmem:[%s1444_s0 + $0x68] sm:$0xff] }
  0x7b   :  { %v809_v33 = vpop.permute.xlu0 %808  ;;  %464 = vmatmul.mubr.f32.vlgmr.msra.gmra.mrb[0].mxu0 %v240_v31  ;;  %544 = vmatmul.mubr.f32.vlgmr.msra.gmra.mrb[0].mxu1 %v256_v32  ;;  %v819_v42 = vpop.permute.xlu1 %818  ;;  %v22_v27 = vld [vmem:[%s1444_s0 + $0x50] sm:$0xff]  ;;  %v87_v32 = vld [vmem:[%s1444_s0 + $0x62] sm:$0xff] }
  0x7c   :  { %v811_v36 = vunpack.i.h.bf16 %v809_v33  ;;  %v810_v37 = vunpack.i.l.bf16 %v809_v33  ;;  %706 = vmatprep.mubr.msk.f32.mxu0 %vm239_vm0, %v80_v30  ;;  %722 = vmatprep.mubr.msk.f32.mxu1 %vm239_vm0, %v96_v7  ;;  %v821_v47 = vunpack.i.h.bf16 %v819_v42  ;;  %v820_v48 = vunpack.i.l.bf16 %v819_v42  ;;  %v38_v28 = vld [vmem:[%s1444_s0 + $0x110] sm:$0xff]  ;;  %v103_v33 = vld [vmem:[%s1444_s0 + $0x122] sm:$0xff] }
  0x7d   :  { %v104_v42 = vld [vmem:[%s1444_s0 + $0x12a] sm:$0xff] }
  0x7e   :  { %v241_v45 = vsel %vm239_vm0, %v16_v34, %v810_v37  ;;  %v257_v46 = vsel %vm239_vm0, %v32_v35, %v811_v36  ;;  %v243_v58 = vsel %vm239_vm0, %v18_v54, %v820_v48  ;;  %v259_v59 = vsel %vm239_vm0, %v34_v55, %v821_v47  ;;  %v23_v35 = vld [vmem:[%s1444_s0 + $0x60] sm:$0xff]  ;;  %v41_v54 = vld [vmem:[%s1444_s0 + $0x138] sm:$0xff] }
  0x7f   :  { %469 = vmatmul.mubr.f32.gmra.mrb[2].mxu0 %v241_v45  ;;  %549 = vmatmul.mubr.f32.gmra.mrb[2].mxu1 %v257_v46  ;;  %v824_v53 = vpop.permute.xlu0 %823  ;;  %v829_v62 = vpop.permute.xlu1 %828  ;;  %v39_v36 = vld [vmem:[%s1444_s0 + $0x120] sm:$0xff]  ;;  %v40_v45 = vld [vmem:[%s1444_s0 + $0x128] sm:$0xff] }
  0x80   :  { %707 = vmatprep.mubr.msk.f32.mxu0 %vm239_vm0, %v81_v40  ;;  %723 = vmatprep.mubr.msk.f32.mxu1 %vm239_vm0, %v97_v41  ;;  %v826_v56 = vunpack.i.h.bf16 %v824_v53  ;;  %v825_v57 = vunpack.i.l.bf16 %v824_v53  ;;  %v831_v1 = vunpack.i.h.bf16 %v829_v62  ;;  %v830_v2 = vunpack.i.l.bf16 %v829_v62  ;;  %v88_v41 = vld [vmem:[%s1444_s0 + $0x6a] sm:$0xff]  ;;  %v25_v53 = vld [vmem:[%s1444_s0 + $0x78] sm:$0xff]  ;;  %v26_v62 = vld [vmem:[%s1444_s0 + $0x80] sm:$0xff] }
  0x82   :  { %v244_v3 = vsel %vm239_vm0, %v19_v63, %v825_v57  ;;  %v260_v4 = vsel %vm239_vm0, %v35_v0, %v826_v56  ;;  %v245_v13 = vsel %vm239_vm0, %v20_v9, %v830_v2  ;;  %v261_v14 = vsel %vm239_vm0, %v36_v10, %v831_v1  ;;  %v42_v63 = vld [vmem:[%s1444_s0 + $0x140] sm:$0xff]  ;;  %v43_v9 = vld [vmem:[%s1444_s0 + $0x150] sm:$0xff] }
  0x83   :  { %474 = vmatmul.mubr.f32.gmra.mrb[4].mxu0 %v242_v49  ;;  %554 = vmatmul.mubr.f32.gmra.mrb[4].mxu1 %v258_v50  ;;  %v834_v8 = vpop.permute.xlu0 %833  ;;  %v839_v17 = vpop.permute.xlu1 %838  ;;  %v89_v50 = vld [vmem:[%s1444_s0 + $0x7a] sm:$0xff] }
  0x84   :  { %708 = vmatprep.mubr.msk.f32.mxu0 %vm239_vm0, %v82_v51  ;;  %724 = vmatprep.mubr.msk.f32.mxu1 %vm239_vm0, %v98_v52  ;;  %v836_v11 = vunpack.i.h.bf16 %v834_v8  ;;  %v835_v12 = vunpack.i.l.bf16 %v834_v8  ;;  %v841_v20 = vunpack.i.h.bf16 %v839_v17  ;;  %v840_v21 = vunpack.i.l.bf16 %v839_v17  ;;  %v105_v51 = vld [vmem:[%s1444_s0 + $0x13a] sm:$0xff]  ;;  %v27_v8 = vld [vmem:[%s1444_s0 + $0x90] sm:$0xff] }
  0x85   :  { %v28_v17 = vld [vmem:[%s1444_s0 + $0x98] sm:$0xff] }
  0x86   :  { %v246_v22 = vsel %vm239_vm0, %v21_v18, %v835_v12  ;;  %v262_v23 = vsel %vm239_vm0, %v37_v19, %v836_v11  ;;  %v247_v7 = vsel %vm239_vm0, %v22_v27, %v840_v21  ;;  %v263_v31 = vsel %vm239_vm0, %v38_v28, %v841_v20  ;;  %v44_v18 = vld [vmem:[%s1444_s0 + $0x158] sm:$0xff]  ;;  %v45_v27 = vld [vmem:[%s1444_s0 + $0x168] sm:$0xff] }
  0x87   :  { %479 = vmatmul.mubr.f32.gmra.mrb[6].mxu0 %v243_v58  ;;  %559 = vmatmul.mubr.f32.gmra.mrb[6].mxu1 %v259_v59  ;;  %v844_v26 = vpop.permute.xlu0 %843  ;;  %v849_v34 = vpop.permute.xlu1 %848  ;;  %v90_v59 = vld [vmem:[%s1444_s0 + $0x82] sm:$0xff] }
  0x88   :  { %709 = vmatprep.mubr.msk.f32.mxu0 %vm239_vm0, %v83_v60  ;;  %725 = vmatprep.mubr.msk.f32.mxu1 %vm239_vm0, %v99_v61  ;;  %v846_v29 = vunpack.i.h.bf16 %v844_v26  ;;  %v845_v30 = vunpack.i.l.bf16 %v844_v26  ;;  %v851_v37 = vunpack.i.h.bf16 %v849_v34  ;;  %v850_v38 = vunpack.i.l.bf16 %v849_v34  ;;  %v106_v60 = vld [vmem:[%s1444_s0 + $0x142] sm:$0xff]  ;;  %v46_v34 = vld [vmem:[%s1444_s0 + $0x170] sm:$0xff] }
  0x89   :  { %v29_v26 = vld [vmem:[%s1444_s0 + $0xa8] sm:$0xff] }
  0x8a   :  { %v248_v39 = vsel %vm239_vm0, %v23_v35, %v845_v30  ;;  %v264_v40 = vsel %vm239_vm0, %v39_v36, %v846_v29  ;;  %v249_v48 = vsel %vm239_vm0, %v24_v44, %v850_v38  ;;  %v265_v49 = vsel %vm239_vm0, %v40_v45, %v851_v37  ;;  %v1398_v37 = vld [vmem:[%s1446_s2] ss:$0 sm:$0xff] }
  0x8b   :  { %484 = vmatmul.mubr.f32.gmra.mrb[8].mxu0 %v244_v3  ;;  %564 = vmatmul.mubr.f32.gmra.mrb[8].mxu1 %v260_v4  ;;  %v854_v43 = vpop.permute.xlu0 %853  ;;  %v859_v52 = vpop.permute.xlu1 %858  ;;  %v91_v4 = vld [vmem:[%s1444_s0 + $0x92] sm:$0xff] }
  0x8c   :  { %710 = vmatprep.mubr.msk.f32.mxu0 %vm239_vm0, %v84_v5  ;;  %726 = vmatprep.mubr.msk.f32.mxu1 %vm239_vm0, %v100_v6  ;;  %v856_v46 = vunpack.i.h.bf16 %v854_v43  ;;  %v855_v47 = vunpack.i.l.bf16 %v854_v43  ;;  %v861_v55 = vunpack.i.h.bf16 %v859_v52  ;;  %v860_v56 = vunpack.i.l.bf16 %v859_v52  ;;  %v107_v5 = vld [vmem:[%s1444_s0 + $0x152] sm:$0xff] }
  0x8e   :  { %v250_v57 = vsel %vm239_vm0, %v25_v53, %v855_v47  ;;  %v266_v58 = vsel %vm239_vm0, %v41_v54, %v856_v46  ;;  %v251_v2 = vsel %vm239_vm0, %v26_v62, %v860_v56  ;;  %v267_v3 = vsel %vm239_vm0, %v42_v63, %v861_v55 }
  0x8f   :  { %489 = vmatmul.mubr.f32.gmra.mrb[10].mxu0 %v245_v13  ;;  %569 = vmatmul.mubr.f32.gmra.mrb[10].mxu1 %v261_v14  ;;  %v864_v61 = vpop.permute.xlu0 %863  ;;  %v869_v6 = vpop.permute.xlu1 %868  ;;  %v92_v14 = vld [vmem:[%s1444_s0 + $0x9a] sm:$0xff] }
  0x90   :  { %711 = vmatprep.mubr.msk.f32.mxu0 %vm239_vm0, %v85_v15  ;;  %727 = vmatprep.mubr.msk.f32.mxu1 %vm239_vm0, %v101_v16  ;;  %v866_v0 = vunpack.i.h.bf16 %v864_v61  ;;  %v865_v1 = vunpack.i.l.bf16 %v864_v61  ;;  %v871_v10 = vunpack.i.h.bf16 %v869_v6  ;;  %v870_v11 = vunpack.i.l.bf16 %v869_v6  ;;  %v108_v15 = vld [vmem:[%s1444_s0 + $0x15a] sm:$0xff] }
  0x92   :  { %v252_v12 = vsel %vm239_vm0, %v27_v8, %v865_v1  ;;  %v268_v13 = vsel %vm239_vm0, %v43_v9, %v866_v0  ;;  %v253_v21 = vsel %vm239_vm0, %v28_v17, %v870_v11 }
  0x93   :  { %494 = vmatmul.mubr.f32.gmra.mrb[12].mxu0 %v246_v22  ;;  %574 = vmatmul.mubr.f32.gmra.mrb[12].mxu1 %v262_v23  ;;  %v874_v16 = vpop.permute.xlu0 %873  ;;  %v269_v22 = vsel %vm239_vm0, %v44_v18, %v871_v10  ;;  %v93_v23 = vld [vmem:[%s1444_s0 + $0xaa] sm:$0xff] }
  0x94   :  { %712 = vmatprep.mubr.msk.f32.mxu0 %vm239_vm0, %v86_v24  ;;  %728 = vmatprep.mubr.msk.f32.mxu1 %vm239_vm0, %v102_v25  ;;  %v876_v19 = vunpack.i.h.bf16 %v874_v16  ;;  %v875_v20 = vunpack.i.l.bf16 %v874_v16  ;;  %v109_v24 = vld [vmem:[%s1444_s0 + $0x16a] sm:$0xff]  ;;  %v879_v25 = vpop.permute.xlu1 %878 }
  0x95   :  { %v881_v28 = vunpack.i.h.bf16 %v879_v25  ;;  %v880_v29 = vunpack.i.l.bf16 %v879_v25 }
  0x96   :  { %v254_v30 = vsel %vm239_vm0, %v29_v26, %v875_v20 }
  0x97   :  { %499 = vmatmul.mubr.f32.gmra.mrb[14].mxu0 %v247_v7  ;;  %579 = vmatmul.mubr.f32.gmra.mrb[14].mxu1 %v263_v31  ;;  %v270_v7 = vsel %vm239_vm0, %v45_v27, %v876_v19  ;;  %v94_v31 = vld [vmem:[%s1444_s0 + $0xb2] sm:$0xff]  ;;  %v271_v36 = vsel %vm239_vm0, %v46_v34, %v881_v28 }
  0x98   :  { %713 = vmatprep.mubr.msk.f32.mxu0 %vm239_vm0, %v87_v32  ;;  %729 = vmatprep.mubr.msk.f32.mxu1 %vm239_vm0, %v103_v33  ;;  %v110_v32 = vld [vmem:[%s1444_s0 + $0x172] sm:$0xff] }
  0x99   :  { %v30_v33 = vld [vmem:[%s1444_s0 + $0xb0] sm:$0xff]  ;;  %s908_s0 = smov [#allocation2]  }
  0x9a   :  { %v255_v35 = vsel %vm239_vm0, %v30_v33, %v880_v29  ;;  %s693_s2 = sshll.u32 %s908_s0, 4  ;;  %s694_s2 = int_to_ptr.vmem [resolvable:$true] %s693_s2 }
  0x9b   :  { %504 = vmatmul.mubr.f32.gmra.mrb[16].mxu0 %v248_v39  ;;  %584 = vmatmul.mubr.f32.gmra.mrb[16].mxu1 %v264_v40  ;;  %s882_s9 = scalar_lea.vmem %s694_s2, 4096  ;;  %p887_p1 = scmp.lt.s32.totalorder %s694_s2, %s694_s2 }
  0x9c   :  { %714 = vmatprep.mubr.msk.f32.mxu0 %vm239_vm0, %v88_v41  ;;  %730 = vmatprep.mubr.msk.f32.mxu1 %vm239_vm0, %v104_v42  ;;  %p883_p0 = scmp.ne.s32.totalorder %s694_s2, %s882_s9  ;;  %p888_p2 = scmp.lt.s32.totalorder %s882_s9, %s882_s9 }
  0x9e   :  { %p889_p3 = por %p888_p2, %p887_p1 }
  0x9f   :  { %509 = vmatmul.mubr.f32.gmra.mrb[18].mxu0 %v249_v48  ;;  %589 = vmatmul.mubr.f32.gmra.mrb[18].mxu1 %v265_v49 }
  0xa0   :  { %715 = vmatprep.mubr.msk.f32.mxu0 %vm239_vm0, %v89_v50  ;;  %731 = vmatprep.mubr.msk.f32.mxu1 %vm239_vm0, %v105_v51  ;;  %p890_p4 = pnand %p889_p3, %p883_p0 }
  0xa3   :  { %514 = vmatmul.mubr.f32.gmra.mrb[20].mxu0 %v250_v57  ;;  %594 = vmatmul.mubr.f32.gmra.mrb[20].mxu1 %v266_v58 }
  0xa4   :  { %716 = vmatprep.mubr.msk.f32.mxu0 %vm239_vm0, %v90_v59  ;;  %732 = vmatprep.mubr.msk.f32.mxu1 %vm239_vm0, %v106_v60 }
  0xa7   :  { %519 = vmatmul.mubr.f32.gmra.mrb[22].mxu0 %v251_v2  ;;  %599 = vmatmul.mubr.f32.gmra.mrb[22].mxu1 %v267_v3 }
  0xa8   :  { %717 = vmatprep.mubr.msk.f32.mxu0 %vm239_vm0, %v91_v4  ;;  %733 = vmatprep.mubr.msk.f32.mxu1 %vm239_vm0, %v107_v5 }
  0xab   :  { %524 = vmatmul.mubr.f32.gmra.mrb[24].mxu0 %v252_v12  ;;  %604 = vmatmul.mubr.f32.gmra.mrb[24].mxu1 %v268_v13 }
  0xac   :  { %718 = vmatprep.mubr.msk.f32.mxu0 %vm239_vm0, %v92_v14  ;;  %734 = vmatprep.mubr.msk.f32.mxu1 %vm239_vm0, %v108_v15 }
  0xaf   :  { %529 = vmatmul.mubr.f32.gmra.mrb[26].mxu0 %v253_v21  ;;  %609 = vmatmul.mubr.f32.gmra.mrb[26].mxu1 %v269_v22 }
  0xb0   :  { %719 = vmatprep.mubr.msk.f32.mxu0 %vm239_vm0, %v93_v23  ;;  %735 = vmatprep.mubr.msk.f32.mxu1 %vm239_vm0, %v109_v24 }
  0xb3   :  { %534 = vmatmul.mubr.f32.gmra.mrb[28].mxu0 %v254_v30  ;;  %614 = vmatmul.mubr.f32.gmra.mrb[28].mxu1 %v270_v7 }
  0xb4   :  { %720 = vmatprep.mubr.msk.f32.mxu0 %vm239_vm0, %v94_v31  ;;  %736 = vmatprep.mubr.msk.f32.mxu1 %vm239_vm0, %v110_v32 }
  0xb7   :  { %539 = vmatmul.mubr.f32.gmra.mrb[30].mxu0 %v255_v35  ;;  %619 = vmatmul.mubr.f32.gmra.mrb[30].mxu1 %v271_v36 }
 0x14e   :  { %v465_v38 = vpop.f32.mrb[0].mxu0  ;;  %v545_v39 = vpop.f32.mrb[0].mxu1 }
 0x14f   :  { %v466_v40 = vadd.f32 %v1398_v37, %v465_v38  ;;  %v546_v41 = vadd.f32 %v1398_v37, %v545_v39  ;;  %v467_v42 = vpop.f32.mrb[1].mxu0  ;;  %v547_v43 = vpop.f32.mrb[1].mxu1 }
 0x151   :  { %v624_v44 = vmax.f32 %v466_v40, 0.0  ;;  %v640_v45 = vmax.f32 %v546_v41, 0.0 }
 0x152   :  { %v470_v46 = vpop.f32.mrb[2].mxu0  ;;  %v550_v47 = vpop.f32.mrb[2].mxu1 }
 0x153   :  { %656 = vst [vmem:[#allocation2] sm:$0xff] %v624_v44  ;;  %672 = vst [vmem:[#allocation2 + $0x80] sm:$0xff] %v640_v45  ;;  %v471_v48 = vadd.f32 %v1398_v37, %v470_v46  ;;  %v551_v49 = vadd.f32 %v1398_v37, %v550_v47  ;;  %v472_v50 = vpop.f32.mrb[3].mxu0  ;;  %v552_v51 = vpop.f32.mrb[3].mxu1 }
 0x155   :  { %v625_v52 = vmax.f32 %v471_v48, 0.0  ;;  %v641_v53 = vmax.f32 %v551_v49, 0.0 }
 0x156   :  { %v475_v54 = vpop.f32.mrb[4].mxu0  ;;  %v555_v55 = vpop.f32.mrb[4].mxu1 }
 0x157   :  { %657 = vst [vmem:[#allocation2 + $0x8] sm:$0xff] %v625_v52  ;;  %673 = vst [vmem:[#allocation2 + $0x88] sm:$0xff] %v641_v53  ;;  %v476_v56 = vadd.f32 %v1398_v37, %v475_v54  ;;  %v556_v57 = vadd.f32 %v1398_v37, %v555_v55  ;;  %v477_v58 = vpop.f32.mrb[5].mxu0  ;;  %v557_v59 = vpop.f32.mrb[5].mxu1 }
 0x159   :  { %v626_v60 = vmax.f32 %v476_v56, 0.0  ;;  %v642_v61 = vmax.f32 %v556_v57, 0.0 }
 0x15a   :  { %v480_v62 = vpop.f32.mrb[6].mxu0  ;;  %v560_v63 = vpop.f32.mrb[6].mxu1 }
 0x15b   :  { %658 = vst [vmem:[#allocation2 + $0x10] sm:$0xff] %v626_v60  ;;  %674 = vst [vmem:[#allocation2 + $0x90] sm:$0xff] %v642_v61  ;;  %v481_v0 = vadd.f32 %v1398_v37, %v480_v62  ;;  %v561_v1 = vadd.f32 %v1398_v37, %v560_v63  ;;  %v482_v2 = vpop.f32.mrb[7].mxu0  ;;  %v562_v3 = vpop.f32.mrb[7].mxu1 }
 0x15d   :  { %v627_v4 = vmax.f32 %v481_v0, 0.0  ;;  %v643_v5 = vmax.f32 %v561_v1, 0.0 }
 0x15e   :  { %v485_v6 = vpop.f32.mrb[8].mxu0  ;;  %v565_v8 = vpop.f32.mrb[8].mxu1 }
 0x15f   :  { %659 = vst [vmem:[#allocation2 + $0x18] sm:$0xff] %v627_v4  ;;  %675 = vst [vmem:[#allocation2 + $0x98] sm:$0xff] %v643_v5  ;;  %v486_v9 = vadd.f32 %v1398_v37, %v485_v6  ;;  %v566_v10 = vadd.f32 %v1398_v37, %v565_v8  ;;  %v487_v11 = vpop.f32.mrb[9].mxu0  ;;  %v567_v12 = vpop.f32.mrb[9].mxu1 }
 0x161   :  { %v628_v13 = vmax.f32 %v486_v9, 0.0  ;;  %v644_v14 = vmax.f32 %v566_v10, 0.0 }
 0x162   :  { %v490_v15 = vpop.f32.mrb[10].mxu0  ;;  %v570_v16 = vpop.f32.mrb[10].mxu1 }
 0x163   :  { %660 = vst [vmem:[#allocation2 + $0x20] sm:$0xff] %v628_v13  ;;  %676 = vst [vmem:[#allocation2 + $0xa0] sm:$0xff] %v644_v14  ;;  %v491_v17 = vadd.f32 %v1398_v37, %v490_v15  ;;  %v571_v18 = vadd.f32 %v1398_v37, %v570_v16  ;;  %v492_v19 = vpop.f32.mrb[11].mxu0  ;;  %v572_v20 = vpop.f32.mrb[11].mxu1 }
 0x165   :  { %v629_v21 = vmax.f32 %v491_v17, 0.0  ;;  %v645_v22 = vmax.f32 %v571_v18, 0.0 }
 0x166   :  { %v495_v23 = vpop.f32.mrb[12].mxu0  ;;  %v575_v24 = vpop.f32.mrb[12].mxu1 }
 0x167   :  { %661 = vst [vmem:[#allocation2 + $0x28] sm:$0xff] %v629_v21  ;;  %677 = vst [vmem:[#allocation2 + $0xa8] sm:$0xff] %v645_v22  ;;  %v496_v25 = vadd.f32 %v1398_v37, %v495_v23  ;;  %v576_v26 = vadd.f32 %v1398_v37, %v575_v24  ;;  %v497_v27 = vpop.f32.mrb[13].mxu0  ;;  %v577_v28 = vpop.f32.mrb[13].mxu1 }
 0x169   :  { %v630_v29 = vmax.f32 %v496_v25, 0.0  ;;  %v646_v30 = vmax.f32 %v576_v26, 0.0 }
 0x16a   :  { %v500_v7 = vpop.f32.mrb[14].mxu0  ;;  %v580_v31 = vpop.f32.mrb[14].mxu1 }
 0x16b   :  { %662 = vst [vmem:[#allocation2 + $0x30] sm:$0xff] %v630_v29  ;;  %678 = vst [vmem:[#allocation2 + $0xb0] sm:$0xff] %v646_v30  ;;  %v501_v32 = vadd.f32 %v1398_v37, %v500_v7  ;;  %v581_v33 = vadd.f32 %v1398_v37, %v580_v31  ;;  %v502_v34 = vpop.f32.mrb[15].mxu0  ;;  %v582_v35 = vpop.f32.mrb[15].mxu1 }
 0x16d   :  { %v631_v36 = vmax.f32 %v501_v32, 0.0  ;;  %v647_v38 = vmax.f32 %v581_v33, 0.0 }
 0x16e   :  { %v505_v39 = vpop.f32.mrb[16].mxu0  ;;  %v585_v40 = vpop.f32.mrb[16].mxu1 }
 0x16f   :  { %663 = vst [vmem:[#allocation2 + $0x38] sm:$0xff] %v631_v36  ;;  %679 = vst [vmem:[#allocation2 + $0xb8] sm:$0xff] %v647_v38  ;;  %v506_v41 = vadd.f32 %v1398_v37, %v505_v39  ;;  %v586_v42 = vadd.f32 %v1398_v37, %v585_v40  ;;  %v507_v43 = vpop.f32.mrb[17].mxu0  ;;  %v587_v44 = vpop.f32.mrb[17].mxu1 }
 0x171   :  { %v632_v45 = vmax.f32 %v506_v41, 0.0  ;;  %v648_v46 = vmax.f32 %v586_v42, 0.0 }
 0x172   :  { %v510_v47 = vpop.f32.mrb[18].mxu0  ;;  %v590_v48 = vpop.f32.mrb[18].mxu1 }
 0x173   :  { %664 = vst [vmem:[#allocation2 + $0x40] sm:$0xff] %v632_v45  ;;  %680 = vst [vmem:[#allocation2 + $0xc0] sm:$0xff] %v648_v46  ;;  %v511_v49 = vadd.f32 %v1398_v37, %v510_v47  ;;  %v591_v50 = vadd.f32 %v1398_v37, %v590_v48  ;;  %v512_v51 = vpop.f32.mrb[19].mxu0  ;;  %v592_v52 = vpop.f32.mrb[19].mxu1 }
 0x175   :  { %v633_v53 = vmax.f32 %v511_v49, 0.0  ;;  %v649_v54 = vmax.f32 %v591_v50, 0.0 }
 0x176   :  { %v515_v55 = vpop.f32.mrb[20].mxu0  ;;  %v595_v56 = vpop.f32.mrb[20].mxu1 }
 0x177   :  { %665 = vst [vmem:[#allocation2 + $0x48] sm:$0xff] %v633_v53  ;;  %681 = vst [vmem:[#allocation2 + $0xc8] sm:$0xff] %v649_v54  ;;  %v516_v57 = vadd.f32 %v1398_v37, %v515_v55  ;;  %v596_v58 = vadd.f32 %v1398_v37, %v595_v56  ;;  %v517_v59 = vpop.f32.mrb[21].mxu0  ;;  %v597_v60 = vpop.f32.mrb[21].mxu1 }
 0x179   :  { %v634_v61 = vmax.f32 %v516_v57, 0.0  ;;  %v650_v62 = vmax.f32 %v596_v58, 0.0 }
 0x17a   :  { %v520_v63 = vpop.f32.mrb[22].mxu0  ;;  %v600_v0 = vpop.f32.mrb[22].mxu1 }
 0x17b   :  { %666 = vst [vmem:[#allocation2 + $0x50] sm:$0xff] %v634_v61  ;;  %682 = vst [vmem:[#allocation2 + $0xd0] sm:$0xff] %v650_v62  ;;  %v521_v1 = vadd.f32 %v1398_v37, %v520_v63  ;;  %v601_v2 = vadd.f32 %v1398_v37, %v600_v0  ;;  %v522_v3 = vpop.f32.mrb[23].mxu0  ;;  %v602_v4 = vpop.f32.mrb[23].mxu1 }
 0x17d   :  { %v635_v5 = vmax.f32 %v521_v1, 0.0  ;;  %v651_v6 = vmax.f32 %v601_v2, 0.0 }
 0x17e   :  { %v525_v8 = vpop.f32.mrb[24].mxu0  ;;  %v605_v9 = vpop.f32.mrb[24].mxu1 }
 0x17f   :  { %667 = vst [vmem:[#allocation2 + $0x58] sm:$0xff] %v635_v5  ;;  %683 = vst [vmem:[#allocation2 + $0xd8] sm:$0xff] %v651_v6  ;;  %v526_v10 = vadd.f32 %v1398_v37, %v525_v8  ;;  %v606_v11 = vadd.f32 %v1398_v37, %v605_v9  ;;  %v527_v12 = vpop.f32.mrb[25].mxu0  ;;  %v607_v13 = vpop.f32.mrb[25].mxu1 }
 0x181   :  { %v636_v14 = vmax.f32 %v526_v10, 0.0  ;;  %v652_v15 = vmax.f32 %v606_v11, 0.0 }
 0x182   :  { %v530_v16 = vpop.f32.mrb[26].mxu0  ;;  %v610_v17 = vpop.f32.mrb[26].mxu1 }
 0x183   :  { %668 = vst [vmem:[#allocation2 + $0x60] sm:$0xff] %v636_v14  ;;  %684 = vst [vmem:[#allocation2 + $0xe0] sm:$0xff] %v652_v15  ;;  %v531_v18 = vadd.f32 %v1398_v37, %v530_v16  ;;  %v611_v19 = vadd.f32 %v1398_v37, %v610_v17  ;;  %v532_v20 = vpop.f32.mrb[27].mxu0  ;;  %v612_v21 = vpop.f32.mrb[27].mxu1 }
 0x185   :  { %v637_v22 = vmax.f32 %v531_v18, 0.0  ;;  %v653_v23 = vmax.f32 %v611_v19, 0.0 }
 0x186   :  { %v535_v24 = vpop.f32.mrb[28].mxu0  ;;  %v615_v25 = vpop.f32.mrb[28].mxu1 }
 0x187   :  { %669 = vst [vmem:[#allocation2 + $0x68] sm:$0xff] %v637_v22  ;;  %685 = vst [vmem:[#allocation2 + $0xe8] sm:$0xff] %v653_v23  ;;  %v536_v26 = vadd.f32 %v1398_v37, %v535_v24  ;;  %v616_v27 = vadd.f32 %v1398_v37, %v615_v25  ;;  %v537_v28 = vpop.f32.mrb[29].mxu0  ;;  %v617_v29 = vpop.f32.mrb[29].mxu1 }
 0x189   :  { %v638_v30 = vmax.f32 %v536_v26, 0.0  ;;  %v654_v7 = vmax.f32 %v616_v27, 0.0 }
 0x18a   :  { %v540_v31 = vpop.f32.mrb[30].mxu0  ;;  %v620_v32 = vpop.f32.mrb[30].mxu1 }
 0x18b   :  { %670 = vst [vmem:[#allocation2 + $0x70] sm:$0xff] %v638_v30  ;;  %686 = vst [vmem:[#allocation2 + $0xf0] sm:$0xff] %v654_v7  ;;  %v541_v33 = vadd.f32 %v1398_v37, %v540_v31  ;;  %v621_v34 = vadd.f32 %v1398_v37, %v620_v32  ;;  %v542_v35 = vpop.f32.mrb[31].mxu0  ;;  %v622_v36 = vpop.f32.mrb[31].mxu1 }
 0x18d   :  { %v639_v38 = vmax.f32 %v541_v33, 0.0  ;;  %v655_v39 = vmax.f32 %v621_v34, 0.0 }
 0x18f   :  { %671 = vst [vmem:[#allocation2 + $0x78] sm:$0xff] %v639_v38  ;;  %687 = vst [vmem:[#allocation2 + $0xf8] sm:$0xff] %v655_v39 }
 0x190   :  { %893 = shalt.err (!%p890_p4)
}
 0x191   :  { %s894_s12 = scalar_lea.hbm %s1447_s3, 4096 }
 0x192   :  { %p895_p5 = scmp.ne.s32.totalorder %s1447_s3, %s894_s12  ;;  %p898_p6 = scmp.lt.u32.totalorder %s894_s12, %s1447_s3 }
 0x194   :  { %p900_p7 = pnand %p898_p6, %p895_p5 }
 0x196   :  { %903 = shalt.err (!%p900_p7)
}
 0x197   :  { %s909_s17 = smov 128   ;;  %s910_s18 = smov 8  }
 0x198   :  { %699 = dma.vmem_to_hbm [thread:$0]  %s694_s2, 4096, %s1447_s3, [#allocation3], %s909_s17, %s909_s17, %s910_s18  }
 0x199   :  { %904 = dma.done.wait [#allocation3], 4096  }
 0x19a   :  { %905 = vsyncadd [#allocation3], 4294963200 }
 0x19b   :  { %703 = vsyncpa [#allocation3], 1 }

</bundles_post_ra>
